<compile_context>
chip_gen: v7x
topology: tpu7x:2x2x1
jax: 0.10.0
libtpu: 0.0.40
codegen_flags: <defaults>
</compile_context>

<pallas_src>
import functools

import jax
import jax.numpy as jnp
from jax.experimental import pallas as pl
from jax.experimental.pallas import tpu as pltpu


def _kge_gather_kernel(idx_ref, ent_hbm, rel_hbm,
                       head_ref, rel_ref, tail_ref, sems,
                       *, tb, b_pad, nwin):
    """One grid step gathers `tb` (head, rel, tail) triples.

    idx_ref  : SMEM (3*b_pad,) int32 -- [heads | rels | tails], scalar-prefetched
    ent_hbm  : HBM  (n_ent, dim)     -- entity table (never copied wholesale)
    rel_hbm  : HBM  (n_rel, dim)     -- relation table
    head_ref : VMEM (tb, dim)        -- output block; rows are DMA'd straight in
    rel_ref  : VMEM (tb, dim)
    tail_ref : VMEM (tb, dim)
    sems     : DMA semaphores, one counting semaphore per output stream
    """
    base = pl.program_id(0) * tb

    def start(i):
        # Issue the three row-gather DMAs for triple `i` of this tile.
        h = idx_ref[base + i]
        r = idx_ref[b_pad + base + i]
        t = idx_ref[2 * b_pad + base + i]
        pltpu.make_async_copy(ent_hbm.at[pl.ds(h, 1), :],
                              head_ref.at[pl.ds(i, 1), :], sems.at[0]).start()
        pltpu.make_async_copy(rel_hbm.at[pl.ds(r, 1), :],
                              rel_ref.at[pl.ds(i, 1), :], sems.at[1]).start()
        pltpu.make_async_copy(ent_hbm.at[pl.ds(t, 1), :],
                              tail_ref.at[pl.ds(i, 1), :], sems.at[2]).start()

    def wait_one():
        # Every transfer on a stream has the same size, so waiting with a
        # fixed single-row descriptor retires exactly one completed gather.
        pltpu.make_async_copy(ent_hbm.at[pl.ds(0, 1), :],
                              head_ref.at[pl.ds(0, 1), :], sems.at[0]).wait()
        pltpu.make_async_copy(rel_hbm.at[pl.ds(0, 1), :],
                              rel_ref.at[pl.ds(0, 1), :], sems.at[1]).wait()
        pltpu.make_async_copy(ent_hbm.at[pl.ds(0, 1), :],
                              tail_ref.at[pl.ds(0, 1), :], sems.at[2]).wait()

    # Prologue: put `nwin` row gathers per stream in flight.
    @pl.loop(0, nwin)
    def _prime(i):
        start(i)

    # Steady state: refill the window first (keeps the DMA queue full), then
    # retire the oldest gather.  After the last iteration every started DMA
    # has been waited on, so the output blocks are fully populated before
    # Pallas' own writeback DMA for this step runs.
    @pl.loop(0, tb)
    def _drain(i):
        @pl.when(i + nwin < tb)
        def _():
            start(i + nwin)

        wait_one()


def kg_emb_forward(x, ent_emb, rel_emb, *, tile_b=256, dma_window=8):
    """Pallas equivalent of KGEmb.forward -> (head_emb, rel_emb, tail_emb)."""
    B = x.shape[0]
    n_ent, dim = ent_emb.shape
    n_rel, dim_r = rel_emb.shape
    assert dim == dim_r, "entity / relation embedding dims must match"

    xi = x.astype(jnp.int32)
    # NOTE: torch nn.Embedding raises on out-of-range indices; we clamp so an
    # invalid index can never become an out-of-bounds HBM DMA.  In-range
    # inputs are bit-exact either way.
    heads = jnp.clip(xi[:, 0], 0, n_ent - 1)
    rels = jnp.clip(xi[:, 1], 0, n_rel - 1)
    tails = jnp.clip(xi[:, 2], 0, n_ent - 1)

    if dim % 128 != 0:
        # Tiny / lane-unaligned embedding dim (e.g. the module default dim=10):
        # a Pallas row gather would move >10x padding per row in both
        # directions, so a plain XLA gather wins.  (Review item: gate the
        # Pallas path on lane-dense dims.)
        return ent_emb[heads], rel_emb[rels], ent_emb[tails]

    # --- Batch tiling: TB triples per grid step, TB a multiple of 8 ---------
    tb = min(int(tile_b), max(8, pl.cdiv(B, 8) * 8))
    tb = pl.cdiv(tb, 8) * 8
    b_pad = pl.cdiv(B, tb) * tb
    pad = b_pad - B
    if pad:
        heads = jnp.pad(heads, (0, pad))   # index 0: harmless filler gathers
        rels = jnp.pad(rels, (0, pad))
        tails = jnp.pad(tails, (0, pad))
    # Flat 1-D layout keeps the SMEM prefetch footprint at 3*b_pad words.
    idx = jnp.concatenate([heads, rels, tails])

    nwin = max(1, min(int(dma_window), tb))

    kernel = functools.partial(_kge_gather_kernel, tb=tb, b_pad=b_pad, nwin=nwin)

    out_blk = pl.BlockSpec((tb, dim), lambda b, idx_s: (b, 0))
    head_o, rel_o, tail_o = pl.pallas_call(
        kernel,
        out_shape=(
            jax.ShapeDtypeStruct((b_pad, dim), ent_emb.dtype),
            jax.ShapeDtypeStruct((b_pad, dim), rel_emb.dtype),
            jax.ShapeDtypeStruct((b_pad, dim), ent_emb.dtype),
        ),
        grid_spec=pltpu.PrefetchScalarGridSpec(
            num_scalar_prefetch=1,              # idx -> SMEM, read in-kernel
            grid=(b_pad // tb,),
            in_specs=[
                pl.BlockSpec(memory_space=pl.ANY),   # entity table stays in HBM
                pl.BlockSpec(memory_space=pl.ANY),   # relation table stays in HBM
            ],
            out_specs=(out_blk, out_blk, out_blk),
            scratch_shapes=[pltpu.SemaphoreType.DMA((3,))],
        ),
        compiler_params=pltpu.CompilerParams(
            # Batch tiles are independent: v7x's two TensorCores split them.
            dimension_semantics=("parallel",),
        ),
    )(idx, ent_emb, rel_emb)

    if pad:
        head_o, rel_o, tail_o = head_o[:B], rel_o[:B], tail_o[:B]
    return head_o, rel_o, tail_o


if __name__ == "__main__":
    key = jax.random.PRNGKey(0)
    k_ent, k_rel, k_h, k_r, k_t = jax.random.split(key, 5)

    # --- Pallas path: lane-dense embedding dim (multiple of 128) ------------
    n_ent, n_rel, dim = 64, 16, 128
    B = 40

    ent_emb = jax.random.normal(k_ent, (n_ent, dim), dtype=jnp.float32)
    rel_emb = jax.random.normal(k_rel, (n_rel, dim), dtype=jnp.float32)
    heads = jax.random.randint(k_h, (B,), 0, n_ent, dtype=jnp.int32)
    rels = jax.random.randint(k_r, (B,), 0, n_rel, dtype=jnp.int32)
    tails = jax.random.randint(k_t, (B,), 0, n_ent, dtype=jnp.int32)
    x = jnp.stack([heads, rels, tails], axis=1)        # (B, 3) int32 triples

    # Small tile so this run exercises a multi-step grid plus a ragged tail tile.
    head_e, rel_e, tail_e = kg_emb_forward(x, ent_emb, rel_emb, tile_b=16)
    jax.block_until_ready((head_e, rel_e, tail_e))

    ref_head = ent_emb[x[:, 0]]
    ref_rel = rel_emb[x[:, 1]]
    ref_tail = ent_emb[x[:, 2]]
    assert head_e.shape == (B, dim) and rel_e.shape == (B, dim) and tail_e.shape == (B, dim)
    assert jnp.array_equal(head_e, ref_head)
    assert jnp.array_equal(rel_e, ref_rel)
    assert jnp.array_equal(tail_e, ref_tail)

    # --- Module-default dim=10: gated XLA-gather fallback -------------------
    ent10 = jax.random.normal(k_ent, (n_ent, 10), dtype=jnp.float32)
    rel10 = jax.random.normal(k_rel, (n_rel, 10), dtype=jnp.float32)
    h10, r10, t10 = kg_emb_forward(x, ent10, rel10)
    jax.block_until_ready((h10, r10, t10))
    assert jnp.array_equal(h10, ent10[x[:, 0]])
    assert jnp.array_equal(r10, rel10[x[:, 1]])
    assert jnp.array_equal(t10, ent10[x[:, 2]])

    print("KERNEL_OK")
</pallas_src>

<mosaic_0001>
module attributes {stable_mosaic.version = 11 : i64} {
  func.func @_kge_gather_kernel(%arg0: i32, %arg1: memref<144xi32, #tpu.memory_space<smem>>, %arg2: memref<64x128xf32, #tpu.memory_space<any>>, %arg3: memref<16x128xf32, #tpu.memory_space<any>>, %arg4: memref<16x128xf32, #tpu.memory_space<vmem>>, %arg5: memref<16x128xf32, #tpu.memory_space<vmem>>, %arg6: memref<16x128xf32, #tpu.memory_space<vmem>>, %arg7: memref<3x!tpu.dma_semaphore, #tpu.memory_space<semaphore_mem>>) attributes {dimension_semantics = [#tpu.dimension_semantics<parallel>], iteration_bounds = array<i64: 3>, scalar_prefetch = 1 : i64, scratch_operands = 1 : i64, tpu.core_type = #tpu.core_type<tc>, window_params = [{}, {}, {transform_indices = @transform_2, window_bounds = array<i64: 16, 128>}, {transform_indices = @transform_3, window_bounds = array<i64: 16, 128>}, {transform_indices = @transform_4, window_bounds = array<i64: 16, 128>}]} {
    %c16_i32 = arith.constant 16 : i32
    %0 = arith.muli %arg0, %c16_i32 : i32
    %c0_i32 = arith.constant 0 : i32
    %c8_i32 = arith.constant 8 : i32
    %1 = arith.addi %c0_i32, %c8_i32 : i32
    %c1_i32 = arith.constant 1 : i32
    scf.for %arg8 = %c0_i32 to %1 step %c1_i32  : i32 {
      %c1_i32_5 = arith.constant 1 : i32
      %3 = arith.muli %arg8, %c1_i32_5 : i32
      %c0_i32_6 = arith.constant 0 : i32
      %4 = arith.addi %c0_i32_6, %3 : i32
      %5 = arith.addi %0, %4 : i32
      %6 = arith.index_cast %5 : i32 to index
      %7 = memref.load %arg1[%6] : memref<144xi32, #tpu.memory_space<smem>>
      %c48_i32 = arith.constant 48 : i32
      %8 = arith.addi %c48_i32, %0 : i32
      %9 = arith.addi %8, %4 : i32
      %10 = arith.index_cast %9 : i32 to index
      %11 = memref.load %arg1[%10] : memref<144xi32, #tpu.memory_space<smem>>
      %c96_i32 = arith.constant 96 : i32
      %12 = arith.addi %c96_i32, %0 : i32
      %13 = arith.addi %12, %4 : i32
      %14 = arith.index_cast %13 : i32 to index
      %15 = memref.load %arg1[%14] : memref<144xi32, #tpu.memory_space<smem>>
      %c0_i32_7 = arith.constant 0 : i32
      %c0_i32_8 = arith.constant 0 : i32
      %16 = tpu.memref_slice %arg2[%7, %c0_i32_8] : memref<64x128xf32, #tpu.memory_space<any>> -> memref<1x128xf32, #tpu.memory_space<any>>
      %c0_i32_9 = arith.constant 0 : i32
      %17 = tpu.memref_slice %arg4[%4, %c0_i32_9] : memref<16x128xf32, #tpu.memory_space<vmem>> -> memref<1x128xf32, #tpu.memory_space<vmem>>
      %18 = tpu.memref_slice %arg7[%c0_i32_7] : memref<3x!tpu.dma_semaphore, #tpu.memory_space<semaphore_mem>> -> memref<1x!tpu.dma_semaphore, #tpu.memory_space<semaphore_mem>>
      %19 = tpu.memref_squeeze %18 : memref<1x!tpu.dma_semaphore, #tpu.memory_space<semaphore_mem>> -> memref<!tpu.dma_semaphore, #tpu.memory_space<semaphore_mem>>
      tpu.enqueue_dma source(%16 : memref<1x128xf32, #tpu.memory_space<any>>) target(%17 : memref<1x128xf32, #tpu.memory_space<vmem>>) target_semaphore(%19 : memref<!tpu.dma_semaphore, #tpu.memory_space<semaphore_mem>>)
      %c1_i32_10 = arith.constant 1 : i32
      %c0_i32_11 = arith.constant 0 : i32
      %20 = tpu.memref_slice %arg3[%11, %c0_i32_11] : memref<16x128xf32, #tpu.memory_space<any>> -> memref<1x128xf32, #tpu.memory_space<any>>
      %c0_i32_12 = arith.constant 0 : i32
      %21 = tpu.memref_slice %arg5[%4, %c0_i32_12] : memref<16x128xf32, #tpu.memory_space<vmem>> -> memref<1x128xf32, #tpu.memory_space<vmem>>
      %22 = tpu.memref_slice %arg7[%c1_i32_10] : memref<3x!tpu.dma_semaphore, #tpu.memory_space<semaphore_mem>> -> memref<1x!tpu.dma_semaphore, #tpu.memory_space<semaphore_mem>>
      %23 = tpu.memref_squeeze %22 : memref<1x!tpu.dma_semaphore, #tpu.memory_space<semaphore_mem>> -> memref<!tpu.dma_semaphore, #tpu.memory_space<semaphore_mem>>
      tpu.enqueue_dma source(%20 : memref<1x128xf32, #tpu.memory_space<any>>) target(%21 : memref<1x128xf32, #tpu.memory_space<vmem>>) target_semaphore(%23 : memref<!tpu.dma_semaphore, #tpu.memory_space<semaphore_mem>>)
      %c2_i32 = arith.constant 2 : i32
      %c0_i32_13 = arith.constant 0 : i32
      %24 = tpu.memref_slice %arg2[%15, %c0_i32_13] : memref<64x128xf32, #tpu.memory_space<any>> -> memref<1x128xf32, #tpu.memory_space<any>>
      %c0_i32_14 = arith.constant 0 : i32
      %25 = tpu.memref_slice %arg6[%4, %c0_i32_14] : memref<16x128xf32, #tpu.memory_space<vmem>> -> memref<1x128xf32, #tpu.memory_space<vmem>>
      %26 = tpu.memref_slice %arg7[%c2_i32] : memref<3x!tpu.dma_semaphore, #tpu.memory_space<semaphore_mem>> -> memref<1x!tpu.dma_semaphore, #tpu.memory_space<semaphore_mem>>
      %27 = tpu.memref_squeeze %26 : memref<1x!tpu.dma_semaphore, #tpu.memory_space<semaphore_mem>> -> memref<!tpu.dma_semaphore, #tpu.memory_space<semaphore_mem>>
      tpu.enqueue_dma source(%24 : memref<1x128xf32, #tpu.memory_space<any>>) target(%25 : memref<1x128xf32, #tpu.memory_space<vmem>>) target_semaphore(%27 : memref<!tpu.dma_semaphore, #tpu.memory_space<semaphore_mem>>)
    }
    %c8_i32_0 = arith.constant 8 : i32
    %c0_i32_1 = arith.constant 0 : i32
    %c16_i32_2 = arith.constant 16 : i32
    %2 = arith.addi %c0_i32_1, %c16_i32_2 : i32
    %c1_i32_3 = arith.constant 1 : i32
    scf.for %arg8 = %c0_i32_1 to %2 step %c1_i32_3  : i32 {
      %c1_i32_5 = arith.constant 1 : i32
      %3 = arith.muli %arg8, %c1_i32_5 : i32
      %c0_i32_6 = arith.constant 0 : i32
      %4 = arith.addi %c0_i32_6, %3 : i32
      %c8_i32_7 = arith.constant 8 : i32
      %5 = arith.addi %4, %c8_i32_7 : i32
      %c16_i32_8 = arith.constant 16 : i32
      %6 = arith.cmpi slt, %5, %c16_i32_8 : i32
      %7 = arith.extui %6 : i1 to i32
      %c0_i32_9 = arith.constant 0 : i32
      %8 = arith.cmpi ne, %7, %c0_i32_9 : i32
      scf.if %8 {
        %c8_i32_24 = arith.constant 8 : i32
        %21 = arith.addi %4, %c8_i32_24 : i32
        %22 = arith.addi %0, %21 : i32
        %23 = arith.index_cast %22 : i32 to index
        %24 = memref.load %arg1[%23] : memref<144xi32, #tpu.memory_space<smem>>
        %c48_i32 = arith.constant 48 : i32
        %25 = arith.addi %c48_i32, %0 : i32
        %26 = arith.addi %25, %21 : i32
        %27 = arith.index_cast %26 : i32 to index
        %28 = memref.load %arg1[%27] : memref<144xi32, #tpu.memory_space<smem>>
        %c96_i32 = arith.constant 96 : i32
        %29 = arith.addi %c96_i32, %0 : i32
        %30 = arith.addi %29, %21 : i32
        %31 = arith.index_cast %30 : i32 to index
        %32 = memref.load %arg1[%31] : memref<144xi32, #tpu.memory_space<smem>>
        %c0_i32_25 = arith.constant 0 : i32
        %c0_i32_26 = arith.constant 0 : i32
        %33 = tpu.memref_slice %arg2[%24, %c0_i32_26] : memref<64x128xf32, #tpu.memory_space<any>> -> memref<1x128xf32, #tpu.memory_space<any>>
        %c0_i32_27 = arith.constant 0 : i32
        %34 = tpu.memref_slice %arg4[%21, %c0_i32_27] : memref<16x128xf32, #tpu.memory_space<vmem>> -> memref<1x128xf32, #tpu.memory_space<vmem>>
        %35 = tpu.memref_slice %arg7[%c0_i32_25] : memref<3x!tpu.dma_semaphore, #tpu.memory_space<semaphore_mem>> -> memref<1x!tpu.dma_semaphore, #tpu.memory_space<semaphore_mem>>
        %36 = tpu.memref_squeeze %35 : memref<1x!tpu.dma_semaphore, #tpu.memory_space<semaphore_mem>> -> memref<!tpu.dma_semaphore, #tpu.memory_space<semaphore_mem>>
        tpu.enqueue_dma source(%33 : memref<1x128xf32, #tpu.memory_space<any>>) target(%34 : memref<1x128xf32, #tpu.memory_space<vmem>>) target_semaphore(%36 : memref<!tpu.dma_semaphore, #tpu.memory_space<semaphore_mem>>)
        %c1_i32_28 = arith.constant 1 : i32
        %c0_i32_29 = arith.constant 0 : i32
        %37 = tpu.memref_slice %arg3[%28, %c0_i32_29] : memref<16x128xf32, #tpu.memory_space<any>> -> memref<1x128xf32, #tpu.memory_space<any>>
        %c0_i32_30 = arith.constant 0 : i32
        %38 = tpu.memref_slice %arg5[%21, %c0_i32_30] : memref<16x128xf32, #tpu.memory_space<vmem>> -> memref<1x128xf32, #tpu.memory_space<vmem>>
        %39 = tpu.memref_slice %arg7[%c1_i32_28] : memref<3x!tpu.dma_semaphore, #tpu.memory_space<semaphore_mem>> -> memref<1x!tpu.dma_semaphore, #tpu.memory_space<semaphore_mem>>
        %40 = tpu.memref_squeeze %39 : memref<1x!tpu.dma_semaphore, #tpu.memory_space<semaphore_mem>> -> memref<!tpu.dma_semaphore, #tpu.memory_space<semaphore_mem>>
        tpu.enqueue_dma source(%37 : memref<1x128xf32, #tpu.memory_space<any>>) target(%38 : memref<1x128xf32, #tpu.memory_space<vmem>>) target_semaphore(%40 : memref<!tpu.dma_semaphore, #tpu.memory_space<semaphore_mem>>)
        %c2_i32_31 = arith.constant 2 : i32
        %c0_i32_32 = arith.constant 0 : i32
        %41 = tpu.memref_slice %arg2[%32, %c0_i32_32] : memref<64x128xf32, #tpu.memory_space<any>> -> memref<1x128xf32, #tpu.memory_space<any>>
        %c0_i32_33 = arith.constant 0 : i32
        %42 = tpu.memref_slice %arg6[%21, %c0_i32_33] : memref<16x128xf32, #tpu.memory_space<vmem>> -> memref<1x128xf32, #tpu.memory_space<vmem>>
        %43 = tpu.memref_slice %arg7[%c2_i32_31] : memref<3x!tpu.dma_semaphore, #tpu.memory_space<semaphore_mem>> -> memref<1x!tpu.dma_semaphore, #tpu.memory_space<semaphore_mem>>
        %44 = tpu.memref_squeeze %43 : memref<1x!tpu.dma_semaphore, #tpu.memory_space<semaphore_mem>> -> memref<!tpu.dma_semaphore, #tpu.memory_space<semaphore_mem>>
        tpu.enqueue_dma source(%41 : memref<1x128xf32, #tpu.memory_space<any>>) target(%42 : memref<1x128xf32, #tpu.memory_space<vmem>>) target_semaphore(%44 : memref<!tpu.dma_semaphore, #tpu.memory_space<semaphore_mem>>)
      } else {
      }
      %c0_i32_10 = arith.constant 0 : i32
      %c0_i32_11 = arith.constant 0 : i32
      %c0_i32_12 = arith.constant 0 : i32
      %9 = tpu.memref_slice %arg2[%c0_i32_11, %c0_i32_12] : memref<64x128xf32, #tpu.memory_space<any>> -> memref<1x128xf32, #tpu.memory_space<any>>
      %c0_i32_13 = arith.constant 0 : i32
      %c0_i32_14 = arith.constant 0 : i32
      %10 = tpu.memref_slice %arg4[%c0_i32_13, %c0_i32_14] : memref<16x128xf32, #tpu.memory_space<vmem>> -> memref<1x128xf32, #tpu.memory_space<vmem>>
      %11 = tpu.memref_slice %arg7[%c0_i32_10] : memref<3x!tpu.dma_semaphore, #tpu.memory_space<semaphore_mem>> -> memref<1x!tpu.dma_semaphore, #tpu.memory_space<semaphore_mem>>
      %12 = tpu.memref_squeeze %11 : memref<1x!tpu.dma_semaphore, #tpu.memory_space<semaphore_mem>> -> memref<!tpu.dma_semaphore, #tpu.memory_space<semaphore_mem>>
      tpu.wait_dma2 semaphore(%12 : memref<!tpu.dma_semaphore, #tpu.memory_space<semaphore_mem>>) src(%9 : memref<1x128xf32, #tpu.memory_space<any>>) dst(%10 : memref<1x128xf32, #tpu.memory_space<vmem>>)
      %c1_i32_15 = arith.constant 1 : i32
      %c0_i32_16 = arith.constant 0 : i32
      %c0_i32_17 = arith.constant 0 : i32
      %13 = tpu.memref_slice %arg3[%c0_i32_16, %c0_i32_17] : memref<16x128xf32, #tpu.memory_space<any>> -> memref<1x128xf32, #tpu.memory_space<any>>
      %c0_i32_18 = arith.constant 0 : i32
      %c0_i32_19 = arith.constant 0 : i32
      %14 = tpu.memref_slice %arg5[%c0_i32_18, %c0_i32_19] : memref<16x128xf32, #tpu.memory_space<vmem>> -> memref<1x128xf32, #tpu.memory_space<vmem>>
      %15 = tpu.memref_slice %arg7[%c1_i32_15] : memref<3x!tpu.dma_semaphore, #tpu.memory_space<semaphore_mem>> -> memref<1x!tpu.dma_semaphore, #tpu.memory_space<semaphore_mem>>
      %16 = tpu.memref_squeeze %15 : memref<1x!tpu.dma_semaphore, #tpu.memory_space<semaphore_mem>> -> memref<!tpu.dma_semaphore, #tpu.memory_space<semaphore_mem>>
      tpu.wait_dma2 semaphore(%16 : memref<!tpu.dma_semaphore, #tpu.memory_space<semaphore_mem>>) src(%13 : memref<1x128xf32, #tpu.memory_space<any>>) dst(%14 : memref<1x128xf32, #tpu.memory_space<vmem>>)
      %c2_i32 = arith.constant 2 : i32
      %c0_i32_20 = arith.constant 0 : i32
      %c0_i32_21 = arith.constant 0 : i32
      %17 = tpu.memref_slice %arg2[%c0_i32_20, %c0_i32_21] : memref<64x128xf32, #tpu.memory_space<any>> -> memref<1x128xf32, #tpu.memory_space<any>>
      %c0_i32_22 = arith.constant 0 : i32
      %c0_i32_23 = arith.constant 0 : i32
      %18 = tpu.memref_slice %arg6[%c0_i32_22, %c0_i32_23] : memref<16x128xf32, #tpu.memory_space<vmem>> -> memref<1x128xf32, #tpu.memory_space<vmem>>
      %19 = tpu.memref_slice %arg7[%c2_i32] : memref<3x!tpu.dma_semaphore, #tpu.memory_space<semaphore_mem>> -> memref<1x!tpu.dma_semaphore, #tpu.memory_space<semaphore_mem>>
      %20 = tpu.memref_squeeze %19 : memref<1x!tpu.dma_semaphore, #tpu.memory_space<semaphore_mem>> -> memref<!tpu.dma_semaphore, #tpu.memory_space<semaphore_mem>>
      tpu.wait_dma2 semaphore(%20 : memref<!tpu.dma_semaphore, #tpu.memory_space<semaphore_mem>>) src(%17 : memref<1x128xf32, #tpu.memory_space<any>>) dst(%18 : memref<1x128xf32, #tpu.memory_space<vmem>>)
    }
    %c16_i32_4 = arith.constant 16 : i32
    return
  }
  func.func @transform_2(%arg0: i32, %arg1: memref<144xi32, #tpu.memory_space<smem>>) -> (i32, i32) {
    %c0_i32 = arith.constant 0 : i32
    %c0_i32_0 = arith.constant 0 : i32
    return %arg0, %c0_i32 : i32, i32
  }
  func.func @transform_3(%arg0: i32, %arg1: memref<144xi32, #tpu.memory_space<smem>>) -> (i32, i32) {
    %c0_i32 = arith.constant 0 : i32
    %c0_i32_0 = arith.constant 0 : i32
    return %arg0, %c0_i32 : i32, i32
  }
  func.func @transform_4(%arg0: i32, %arg1: memref<144xi32, #tpu.memory_space<smem>>) -> (i32, i32) {
    %c0_i32 = arith.constant 0 : i32
    %c0_i32_0 = arith.constant 0 : i32
    return %arg0, %c0_i32 : i32, i32
  }
}

</mosaic_0001>

<bundles_post_ra>
// kernel: tpu_custom_call.1
= control target key start
LH: loop header
LB: loop body
LE: loop exit
PB: predicated region body
PF: predicated region fallthrough
CT: control target
= control target key end

     0   :  { %s1271_s0 = inlined_call_operand.hbm [shape: s32[144], index: 0, kind: input, shape index: {}]   ;;  %s1272_s1 = inlined_call_operand.hbm [shape: f32[64,128], index: 1, kind: input, shape index: {}]   ;;  %s1273_s2 = inlined_call_operand.hbm [shape: f32[16,128], index: 2, kind: input, shape index: {}]   ;;  %s1274_s3 = inlined_call_operand.hbm [shape: f32[48,128], index: 3, kind: output, shape index: {0}]   ;;  %s1275_s4 = inlined_call_operand.hbm [shape: f32[48,128], index: 4, kind: output, shape index: {1}]   ;;  %s1276_s5 = inlined_call_operand.hbm [shape: f32[48,128], index: 5, kind: output, shape index: {2}]  }
   0x1   :  { %1294 = sst [smem:[#allocation40_spill]] %s1274_s3  ;;  %s557_s20 = scalar_lea.hbm %s1271_s0, 32 }
   0x2   :  { %1295 = sst [smem:[#allocation41_spill]] %s1275_s4  ;;  %p558_p0 = scmp.ne.s32.totalorder %s1271_s0, %s557_s20 }
   0x3   :  { %1296 = sst [smem:[#allocation42_spill]] %s1276_s5  ;;  %p561_p1 = scmp.lt.u32.totalorder %s557_s20, %s1271_s0 }
   0x5   :  { %p563_p2 = pnand %p561_p1, %p558_p0 }
   0x7   :  { %566 = shalt.err (!%p563_p2)  }
   0x8   :  { %s863_s25 = smov [#allocation4]  }
   0x9   :  { %12 = dma.hbm_to_smem %s1271_s0, 32, %s863_s25, [#allocation3] }
   0xa   :  { %827 = dma.done.wait [#allocation3], 32 }
   0xb   :  { %828 = vsyncadd [#allocation3], 4294967264 }
   0xc   :  { %14 = sfence }
   0xd   :  { %15 = vsyncpa [#allocation6], 0 }
   0xe   :  { %17 = vsyncpa [#allocation6 + $0x1], 0 }
   0xf   :  { %18 = vsyncpa [#allocation8], 0 }
  0x10   :  { %20 = vsyncpa [#allocation8 + $0x1], 0  ;;  %s911_s28 = smov 0   ;;  %s913_s29 = smov 0  }
  0x11   :  { %s915_s30 = smov 0  }
  0x12 LB: > { %1297 = sst [smem:[#allocation33_spill]] %s845_s28  ;;  %s1277_s0 = sadd.s32 4294967295, %s853_s30   ;;  %s853_s30 = sphi %s915_s30, %s1323_s30   ;;  %s849_s29 = sphi %s913_s29, %s1325_s29   ;;  %s845_s28 = sphi %s911_s28, %s1324_s28  }
  0x13   : > { %1298 = sst [smem:[#allocation34_spill]] %s849_s29  ;;  %s928_s6 = sadd.s32 1, %s853_s30  }
  0x14   : > { %1299 = sst [smem:[#allocation35_spill]] %s928_s6  ;;  %s29_s7 = ssub.s32 %s853_s30, %s928_s6 }
  0x15   : > { %s32_s8 = sadd.s32 1, %s849_s29  ;;  %p30_p3 = scmp.eq.s32.totalorder %s29_s7, 0 }
  0x16   : > { %p454_p4 = scmp.ne.s32.totalorder %s29_s7, 0  ;;  %p36_p5 = scmp.eq.s32.totalorder %s853_s30, 2 }
  0x17   : > { %p41_p6 = scmp.ne.s32.totalorder %s849_s29, %s845_s28  ;;  %p42_p8 = scmp.eq.s32.totalorder %s1277_s0, 2 }
  0x18   : > { %s937_s9 = scalar_select %p30_p3, %s849_s29, %s32_s8  }
  0x19   : > { %p939_p7 = por %p454_p4, %p36_p5  ;;  %p945_p9 = por %p42_p8, %p41_p6 }
  0x1a   : > { %1300 = sst [smem:[#allocation36_spill]] %s937_s9  ;;  %p457_p10 = scmp.ge.s32.totalorder %s853_s30, 3 }
  0x1b   : > { %s1301_s10 = scalar_select %p939_p7, 1, 0 }
  0x1c   : > { %s1303_s11 = scalar_select %p945_p9, 1, 0 }
  0x1d   : > { %1302 = sst [smem:[#allocation37_spill]] %s1301_s10  ;;  %89 = sbr.rel (%p457_p10) target bundleno = 300 (0x12c), region = 12 }
  0x1e   : > { %1304 = sst [smem:[#allocation38_spill]] %s1303_s11 }
  0x24   : > { %s1278_s12 = sand.u32 1, %s849_s29   ;;  %s952_s13 = sshll.u32 %s853_s30, 4 }
  0x25   : > { %s458_s14 = sshll.u32 %s1278_s12, 4  ;;  %s962_s18 = smov 0  }
  0x26   : > { %s956_s15 = scalar_lea.vmem [#allocation5], %s458_s14  ;;  %s958_s16 = scalar_lea.vmem [#allocation7], %s458_s14 }
  0x27   : > { %1305 = sst [smem:[#allocation39_spill]] %s956_s15  ;;  %s960_s17 = scalar_lea.vmem [#allocation9], %s458_s14 }
  0x28 LB: >> { %s1282_s19 = sadd.s32 48, %s952_s13  ;;  %s121_s20 = sadd.s32 %s857_s18, %s952_s13  ;;  %s857_s18 = sphi %s962_s18, %s120_s18  }
  0x29   : >> { %s131_s21 = scalar_lea.vmem %s956_s15, %s857_s18 [#allocation5]  ;;  %s122_s22 = sld [smem:[#allocation4 + %s121_s20]] }
  0x2a   : >> { %s1284_s23 = sadd.s32 96, %s952_s13  ;;  %s139_s24 = sshll.u32 %s131_s21, 4  ;;  %s140_s24 = int_to_ptr.vmem [resolvable:$true] %s139_s24 }
  0x2b   : >> { %s124_s25 = sadd.s32 %s857_s18, %s1282_s19  ;;  %s145_s27 = scalar_lea.vmem %s958_s16, %s857_s18 [#allocation7] }
  0x2c   : >> { %s976_s26 = sld [smem:[#allocation4 + %s124_s25]]  ;;  %s127_s7 = sadd.s32 %s857_s18, %s1284_s23 }
  0x2d   : >> { %s154_s8 = sshll.u32 %s145_s27, 4  ;;  %s983_s14 = sld [smem:[#allocation4 + %s127_s7]]  ;;  %s990_s8 = int_to_ptr.vmem [resolvable:$true] %s154_s8 }
  0x2e   : >> { %s160_s0 = scalar_lea.vmem %s960_s17, %s857_s18 [#allocation9]  ;;  %s995_s28 = scalar_lea.hbm %s1272_s1, 1024 }
  0x2f   : >> { %s462_s12 = sshll.u32 %s122_s22, 4  ;;  %s169_s9 = sshll.u32 %s160_s0, 4  ;;  %s1009_s9 = int_to_ptr.vmem [resolvable:$true] %s169_s9 }
  0x30   : >> { %s130_s20 = scalar_lea.hbm %s1272_s1, %s462_s12 }
  0x31   : >> { %s567_s21 = scalar_lea.hbm %s130_s20, 16  ;;  %p570_p12 = scmp.lt.u32.totalorder %s130_s20, %s1272_s1 }
  0x32   : >> { %p568_p11 = scmp.ne.s32.totalorder %s130_s20, %s567_s21  ;;  %p571_p13 = scmp.lt.u32.totalorder %s995_s28, %s567_s21 }
  0x33   : >> { %p573_p1 = scmp.lt.u32.totalorder %s567_s21, %s130_s20 }
  0x34   : >> { %p572_p0 = por %p571_p13, %p570_p12 }
  0x36   : >> { %p574_p2 = por %p573_p1, %p572_p0 }
  0x38   : >> { %p575_p3 = pnand %p574_p2, %p568_p11 }
  0x3a   : >> { %578 = shalt.err (!%p575_p3)  }
  0x3b   : >> { %s579_s0 = scalar_lea.vmem %s140_s24, 16  ;;  %s864_s6 = smov [#allocation5]  }
  0x3c   : >> { %p580_p4 = scmp.ne.s32.totalorder %s140_s24, %s579_s0  ;;  %s581_s11 = sshll.u32 %s864_s6, 4  ;;  %s1001_s11 = int_to_ptr.vmem [resolvable:$false] %s581_s11 }
  0x3d   : >> { %s1004_s12 = scalar_lea.vmem %s1001_s11, 512  ;;  %p584_p5 = scmp.lt.s32.totalorder %s140_s24, %s1001_s11 }
  0x3e   : >> { %p585_p6 = scmp.lt.s32.totalorder %s1004_s12, %s579_s0 }
  0x40   : >> { %p586_p8 = por %p585_p6, %p584_p5 }
  0x42   : >> { %p587_p10 = pnand %p586_p8, %p580_p4 }
  0x44   : >> { %590 = shalt.err (!%p587_p10)  }
  0x45   : >> { %142 = dma.hbm_to_vmem [thread:$0]  %s130_s20, 16, %s140_s24, [#allocation2] }
  0x46   : >> { %s463_s19 = sshll.u32 %s976_s26, 4  ;;  %s464_s27 = sshll.u32 %s983_s14, 4 }
  0x47   : >> { %s144_s25 = scalar_lea.hbm %s1273_s2, %s463_s19  ;;  %s1287_s0 = scalar_lea.hbm %s1273_s2, 256 }
  0x48   : >> { %s591_s7 = scalar_lea.hbm %s144_s25, 16  ;;  %p594_p12 = scmp.lt.u32.totalorder %s144_s25, %s1273_s2 }
  0x49   : >> { %p592_p11 = scmp.ne.s32.totalorder %s144_s25, %s591_s7  ;;  %p595_p13 = scmp.lt.u32.totalorder %s1287_s0, %s591_s7 }
  0x4a   : >> { %p597_p1 = scmp.lt.u32.totalorder %s591_s7, %s144_s25 }
  0x4b   : >> { %p596_p0 = por %p595_p13, %p594_p12 }
  0x4d   : >> { %p598_p2 = por %p597_p1, %p596_p0 }
  0x4f   : >> { %p599_p3 = pnand %p598_p2, %p592_p11 }
  0x51   : >> { %602 = shalt.err (!%p599_p3)  }
  0x52   : >> { %s603_s26 = scalar_lea.vmem %s990_s8, 16  ;;  %s865_s23 = smov [#allocation7]  }
  0x53   : >> { %p604_p4 = scmp.ne.s32.totalorder %s990_s8, %s603_s26  ;;  %s605_s14 = sshll.u32 %s865_s23, 4  ;;  %s1027_s14 = int_to_ptr.vmem [resolvable:$false] %s605_s14 }
  0x54   : >> { %s1030_s5 = scalar_lea.vmem %s1027_s14, 512  ;;  %p608_p5 = scmp.lt.s32.totalorder %s990_s8, %s1027_s14 }
  0x55   : >> { %p609_p6 = scmp.lt.s32.totalorder %s1030_s5, %s603_s26 }
  0x57   : >> { %p610_p8 = por %p609_p6, %p608_p5 }
  0x59   : >> { %p611_p10 = pnand %p610_p8, %p604_p4 }
  0x5b   : >> { %614 = shalt.err (!%p611_p10)  }
  0x5c   : >> { %157 = dma.hbm_to_vmem [thread:$0]  %s144_s25, 16, %s990_s8, [#allocation2 + $0x1] }
  0x5d   : >> { %s159_s22 = scalar_lea.hbm %s1272_s1, %s464_s27 }
  0x5e   : >> { %s615_s21 = scalar_lea.hbm %s159_s22, 16  ;;  %p618_p12 = scmp.lt.u32.totalorder %s159_s22, %s1272_s1 }
  0x5f   : >> { %p616_p11 = scmp.ne.s32.totalorder %s159_s22, %s615_s21  ;;  %p619_p13 = scmp.lt.u32.totalorder %s995_s28, %s615_s21 }
  0x60   : >> { %p621_p1 = scmp.lt.u32.totalorder %s615_s21, %s159_s22 }
  0x61   : >> { %p620_p0 = por %p619_p13, %p618_p12 }
  0x63   : >> { %p622_p2 = por %p621_p1, %p620_p0 }
  0x65   : >> { %p623_p3 = pnand %p622_p2, %p616_p11 }
  0x67   : >> { %626 = shalt.err (!%p623_p3)  }
  0x68   : >> { %s627_s8 = scalar_lea.vmem %s1009_s9, 16  ;;  %s866_s25 = smov [#allocation9]  }
  0x69   : >> { %p628_p4 = scmp.ne.s32.totalorder %s1009_s9, %s627_s8  ;;  %s629_s24 = sshll.u32 %s866_s25, 4  ;;  %s1045_s24 = int_to_ptr.vmem [resolvable:$false] %s629_s24 }
  0x6a   : >> { %s1048_s27 = scalar_lea.vmem %s1045_s24, 512  ;;  %p632_p5 = scmp.lt.s32.totalorder %s1009_s9, %s1045_s24 }
  0x6b   : >> { %p633_p6 = scmp.lt.s32.totalorder %s1048_s27, %s627_s8 }
  0x6d   : >> { %p634_p8 = por %p633_p6, %p632_p5 }
  0x6f   : >> { %p635_p10 = pnand %p634_p8, %p628_p4 }
  0x71   : >> { %638 = shalt.err (!%p635_p10)  }
  0x72   : >> { %172 = dma.hbm_to_vmem [thread:$0]  %s159_s22, 16, %s1009_s9, [#allocation2 + $0x2] }
  0x73   : >> { %s120_s18 = sadd.s32 1, %s857_s18  }
  0x74   : >> { %p117_p11 = scmp.ge.s32.totalorder %s120_s18, 8  }
  0x75   : > { %s1057_s20 = smov (%p117_p11), 0  }
  0x76   : > { %119 = sbr.rel (!%p117_p11) target bundleno = 40 (0x28), region = 138 }
  0x7d LB: >> { %s1306_s15 = sld [smem:[#allocation39_spill]]  ;;  %s1063_s9 = sadd.s32 8, %s861_s20  ;;  %s861_s20 = sphi %s1057_s20, %s178_s20  }
  0x7e   : >> { %p512_p12 = scmp.lt.s32.totalorder %s1063_s9, 16  ;;  %s184_s26 = sadd.s32 %s952_s13, %s1063_s9 }
  0x7f   : >> { %s1307_s19 = sadd.s32 48, %s952_s13  ;;  %s390_s8 = scalar_lea.vmem %s958_s16, %s861_s20 [#allocation7] }
  0x80   : >> { %s487_s29 = scalar_select %p512_p12, [#allocation4], [#allocation24] }
  0x81   : >> { %s1327_s26 = smov (!%p512_p12, %s184_s26), 0  ;;  %s187_s22 = sadd.s32 %s1063_s9, %s1307_s19 }
  0x82   : >> { %s185_s21 = sld [smem:[%s487_s29 + %s1327_s26]]  ;;  %s1329_s22 = smov (!%p512_p12, %s187_s22), 0 }
  0x83   : >> { %s386_s18 = scalar_lea.vmem %s1306_s15, %s861_s20  ;;  %s391_s0 = scalar_lea.vmem %s390_s8, 8 [#allocation7] }
  0x84   : >> { %s387_s23 = scalar_lea.vmem %s386_s18, 8  ;;  %s217_s18 = sshll.u32 %s391_s0, 4  ;;  %s1088_s18 = int_to_ptr.vmem [resolvable:$true] %s217_s18 }
  0x85   : >> { %s202_s7 = sshll.u32 %s387_s23, 4  ;;  %s203_s7 = int_to_ptr.vmem [resolvable:$true] %s202_s7 }
  0x86   : >> { %s489_s6 = scalar_select %p512_p12, [#allocation4], [#allocation25] }
  0x88   : >> { %s1083_s25 = sld [smem:[%s489_s6 + %s1329_s22]]  ;;  %s466_s15 = sshll.u32 %s185_s21, 4 }
  0x89   : >> { %s193_s10 = scalar_lea.hbm %s1272_s1, %s466_s15 }
  0x8a   : >> { %s639_s26 = scalar_lea.hbm %s193_s10, 16  ;;  %p644_p2 = scmp.lt.u32.totalorder %s193_s10, %s1272_s1 }
  0x8b   : >> { %p640_p13 = scmp.ne.s32.totalorder %s193_s10, %s639_s26  ;;  %p645_p3 = scmp.lt.u32.totalorder %s995_s28, %s639_s26 }
  0x8c   : >> { %p647_p5 = scmp.lt.u32.totalorder %s639_s26, %s193_s10 }
  0x8d   : >> { %p641_p0 = pnand %p640_p13, %p512_p12  ;;  %p646_p4 = por %p645_p3, %p644_p2 }
  0x8f   : >> { %p642_p1 = pneg %p641_p0  ;;  %p648_p6 = por %p647_p5, %p646_p4 }
  0x91   : >> { %p649_p8 = pnand %p648_p6, %p642_p1 }
  0x93   : >> { %652 = shalt.err (!%p649_p8)  }
  0x94   : >> { %s653_s0 = scalar_lea.vmem %s203_s7, 16  ;;  %p660_p13 = scmp.lt.s32.totalorder %s203_s7, %s1001_s11 }
  0x95   : >> { %p654_p10 = scmp.ne.s32.totalorder %s203_s7, %s653_s0  ;;  %p661_p0 = scmp.lt.s32.totalorder %s1004_s12, %s653_s0 }
  0x97   : >> { %p655_p11 = pnand %p654_p10, %p512_p12  ;;  %p662_p7 = por %p661_p0, %p660_p13 }
  0x99   : >> { %p656_p9 = pneg %p655_p11 }
  0x9b   : >> { %p663_p2 = pnand %p662_p7, %p656_p9 }
  0x9d   : >> { %666 = shalt.err (!%p663_p2)  }
  0x9e   : >> { %493 = dma.hbm_to_vmem [thread:$0]  (%p512_p12), %s193_s10, 16, %s203_s7, [#allocation2] }
  0x9f   : >> { %s491_s3 = scalar_select %p512_p12, [#allocation4], [#allocation26] }
  0xa0   : >> { %s467_s4 = sshll.u32 %s1083_s25, 4  ;;  %s1308_s15 = sadd.s32 96, %s952_s13 }
  0xa1   : >> { %s190_s19 = sadd.s32 %s1063_s9, %s1308_s15  ;;  %s207_s6 = scalar_lea.hbm %s1273_s2, %s467_s4 }
  0xa2   : >> { %s394_s8 = scalar_lea.vmem %s960_s17, %s861_s20 [#allocation9]  ;;  %s667_s26 = scalar_lea.hbm %s207_s6, 16 }
  0xa3   : >> { %p668_p7 = scmp.ne.s32.totalorder %s207_s6, %s667_s26  ;;  %p672_p3 = scmp.lt.u32.totalorder %s207_s6, %s1273_s2 }
  0xa4   : >> { %s1309_s25 = scalar_lea.hbm %s1273_s2, 256  ;;  %p675_p6 = scmp.lt.u32.totalorder %s667_s26, %s207_s6 }
  0xa5   : >> { %p669_p9 = pnand %p668_p7, %p512_p12  ;;  %p673_p4 = scmp.lt.u32.totalorder %s1309_s25, %s667_s26 }
  0xa7   : >> { %p670_p1 = pneg %p669_p9  ;;  %p674_p5 = por %p673_p4, %p672_p3 }
  0xa9   : >> { %p676_p8 = por %p675_p6, %p674_p5 }
  0xab   : >> { %p677_p10 = pnand %p676_p8, %p670_p1 }
  0xad   : >> { %680 = shalt.err (!%p677_p10)  }
  0xae   : >> { %s681_s0 = scalar_lea.vmem %s1088_s18, 16  ;;  %p688_p2 = scmp.lt.s32.totalorder %s1088_s18, %s1027_s14 }
  0xaf   : >> { %p682_p11 = scmp.ne.s32.totalorder %s1088_s18, %s681_s0  ;;  %p689_p7 = scmp.lt.s32.totalorder %s1030_s5, %s681_s0 }
  0xb1   : >> { %p683_p13 = pnand %p682_p11, %p512_p12  ;;  %p690_p9 = por %p689_p7, %p688_p2 }
  0xb3   : >> { %p684_p0 = pneg %p683_p13 }
  0xb5   : >> { %p691_p3 = pnand %p690_p9, %p684_p0 }
  0xb7   : >> { %694 = shalt.err (!%p691_p3)  }
  0xb8   : >> { %494 = dma.hbm_to_vmem [thread:$0]  (%p512_p12), %s207_s6, 16, %s1088_s18, [#allocation2 + $0x1] }
  0xb9   : >> { %s1331_s19 = smov (!%p512_p12, %s190_s19), 0  ;;  %s395_s4 = scalar_lea.vmem %s394_s8, 8 [#allocation9] }
  0xba   : >> { %s191_s15 = sld [smem:[%s491_s3 + %s1331_s19]]  ;;  %s232_s22 = sshll.u32 %s395_s4, 4  ;;  %s233_s22 = int_to_ptr.vmem [resolvable:$true] %s232_s22 }
  0xc0   : >> { %s468_s21 = sshll.u32 %s191_s15, 4 }
  0xc1   : >> { %s222_s29 = scalar_lea.hbm %s1272_s1, %s468_s21 }
  0xc2   : >> { %s695_s10 = scalar_lea.hbm %s222_s29, 16  ;;  %p700_p6 = scmp.lt.u32.totalorder %s222_s29, %s1272_s1 }
  0xc3   : >> { %p696_p1 = scmp.ne.s32.totalorder %s222_s29, %s695_s10  ;;  %p701_p8 = scmp.lt.u32.totalorder %s995_s28, %s695_s10 }
  0xc4   : >> { %p703_p11 = scmp.lt.u32.totalorder %s695_s10, %s222_s29 }
  0xc5   : >> { %p697_p4 = pnand %p696_p1, %p512_p12  ;;  %p702_p10 = por %p701_p8, %p700_p6 }
  0xc7   : >> { %p698_p5 = pneg %p697_p4  ;;  %p704_p13 = por %p703_p11, %p702_p10 }
  0xc9   : >> { %p705_p0 = pnand %p704_p13, %p698_p5 }
  0xcb   : >> { %708 = shalt.err (!%p705_p0)  }
  0xcc   : >> { %s709_s18 = scalar_lea.vmem %s233_s22, 16  ;;  %p716_p3 = scmp.lt.s32.totalorder %s233_s22, %s1045_s24 }
  0xcd   : >> { %p710_p2 = scmp.ne.s32.totalorder %s233_s22, %s709_s18  ;;  %p717_p1 = scmp.lt.s32.totalorder %s1048_s27, %s709_s18 }
  0xcf   : >> { %p711_p7 = pnand %p710_p2, %p512_p12  ;;  %p718_p4 = por %p717_p1, %p716_p3 }
  0xd1   : >> { %p712_p9 = pneg %p711_p7 }
  0xd3   : >> { %p719_p6 = pnand %p718_p4, %p712_p9 }
  0xd5   : >> { %722 = shalt.err (!%p719_p6)  }
  0xd6   : >> { %495 = dma.hbm_to_vmem [thread:$0]  (%p512_p12), %s222_s29, 16, %s233_s22, [#allocation2 + $0x2] }
  0xd7   : >> { %829 = dma.done.wait [#allocation2], 16 }
  0xd8   : >> { %830 = vsyncadd [#allocation2], 4294967280 }
  0xd9   : >> { %831 = dma.done.wait [#allocation2 + $0x1], 16 }
  0xda   : >> { %832 = vsyncadd [#allocation2 + $0x1], 4294967280 }
  0xdb   : >> { %833 = dma.done.wait [#allocation2 + $0x2], 16 }
  0xdc   : >> { %834 = vsyncadd [#allocation2 + $0x2], 4294967280  ;;  %s178_s20 = sadd.s32 1, %s861_s20  }
  0xdd   : >> { %p175_p5 = scmp.ge.s32.totalorder %s178_s20, 16  }
  0xde   : > { %s1310_s3 = sld [smem:[#allocation37_spill]] (%p175_p5)  ;;  %s250_s9 = sand.u32 (%p175_p5), 1, %s853_s30  }
  0xdf   : > { %177 = sbr.rel (!%p175_p5) target bundleno = 125 (0x7d), region = 149  ;;  %s1154_s19 = sshll.u32 (%p175_p5), %s853_s30, 8 }
  0xe0   : > { %s1311_s0 = sld [smem:[#allocation41_spill]] (%p175_p5)  ;;  %s285_s15 = sshll.u32 (%p175_p5), %s958_s16, 4  ;;  %s1163_s15 = int_to_ptr.vmem [resolvable:$true] %s285_s15 }
  0xe1   : > { %s1312_s13 = sld [smem:[#allocation40_spill]] (%p175_p5)  ;;  %s1171_s21 = scalar_lea.sflag (%p175_p5), [#allocation8], %s250_s9 }
  0xe2   : > { %s723_s26 = scalar_lea.vmem (%p175_p5), %s1163_s15, 256  ;;  %p730_p13 = scmp.lt.s32.totalorder (%p175_p5), %s1163_s15, %s1027_s14 }
  0xe3   : > { %p724_p12 = scmp.ne.s32.totalorder (%p175_p5), %s1163_s15, %s723_s26  ;;  %p731_p0 = scmp.lt.s32.totalorder (%p175_p5), %s1030_s5, %s723_s26 }
  0xe4   : > { %p1313_p8 = scmp.ne.s32.totalorder (%p175_p5), %s1310_s3, 0 }
  0xe5   : > { %p732_p2 = por (%p175_p5), %p731_p0, %p730_p13 }
  0xe6   : > { %s1160_s4 = scalar_lea.hbm %s1311_s0, %s1154_s19  ;;  %p725_p10 = pnand %p724_p12, %p1313_p8 }
  0xe7   : > { %s1169_s22 = scalar_lea.hbm %s1312_s13, %s1154_s19 }
  0xe8   : > { %p726_p11 = pneg %p725_p10 }
  0xea   : > { %p733_p7 = pnand %p732_p2, %p726_p11 }
  0xec   : > { %736 = shalt.err (!%p733_p7)
}
  0xed   : > { %s737_s16 = scalar_lea.hbm %s1160_s4, 256  ;;  %s741_s10 = scalar_lea.hbm %s1311_s0, 768 }
  0xee   : > { %p738_p9 = scmp.ne.s32.totalorder %s1160_s4, %s737_s16  ;;  %p742_p4 = scmp.lt.u32.totalorder %s1160_s4, %s1311_s0 }
  0xef   : > { %p743_p6 = scmp.lt.u32.totalorder %s741_s10, %s737_s16  ;;  %p745_p12 = scmp.lt.u32.totalorder %s737_s16, %s1160_s4 }
  0xf0   : > { %p739_p3 = pnand %p738_p9, %p1313_p8 }
  0xf1   : > { %p744_p5 = por %p743_p6, %p742_p4 }
  0xf2   : > { %p740_p1 = pneg %p739_p3 }
  0xf3   : > { %p746_p10 = por %p745_p12, %p744_p5 }
  0xf5   : > { %p747_p11 = pnand %p746_p10, %p740_p1 }
  0xf7   : > { %750 = shalt.err (!%p747_p11)
}
  0xf8   : > { %s867_s5 = smov 128   ;;  %s1314_s25 = sld [smem:[#allocation39_spill]] }
  0xf9   : > { %s1315_s18 = sld [smem:[#allocation34_spill]]  ;;  %s868_s9 = smov 8  }
  0xfa   : > { %497 = dma.vmem_to_hbm [thread:$0]  (%p1313_p8), %s1163_s15, 256, %s1160_s4, %s1171_s21, %s867_s5, %s867_s5, %s868_s9  }
  0xfb   : > { %s1316_s28 = sld [smem:[#allocation42_spill]]  ;;  %s301_s23 = sshll.u32 %s960_s17, 4  ;;  %s302_s23 = int_to_ptr.vmem [resolvable:$true] %s301_s23 }
  0xfe   : > { %s269_s6 = sshll.u32 %s1314_s25, 4  ;;  %s270_s6 = int_to_ptr.vmem [resolvable:$true] %s269_s6 }
  0xff   : > { %s1318_s29 = sand.u32 1, %s1315_s18   ;;  %s751_s7 = scalar_lea.vmem %s270_s6, 256 }
 0x100   : > { %s246_s10 = scalar_lea.sflag [#allocation6], %s1318_s29  ;;  %p752_p13 = scmp.ne.s32.totalorder %s270_s6, %s751_s7 }
 0x101   : > { %s1317_s26 = smov %s1316_s28  ;;  %s1205_s16 = scalar_lea.hbm %s1316_s28, %s1154_s19 }
 0x102   : > { %p753_p0 = pnand %p752_p13, %p1313_p8  ;;  %p758_p7 = scmp.lt.s32.totalorder %s270_s6, %s1001_s11 }
 0x103   : > { %p759_p9 = scmp.lt.s32.totalorder %s1004_s12, %s751_s7 }
 0x104   : > { %p754_p2 = pneg %p753_p0 }
 0x105   : > { %p760_p3 = por %p759_p9, %p758_p7 }
 0x107   : > { %p761_p1 = pnand %p760_p3, %p754_p2 }
 0x109   : > { %764 = shalt.err (!%p761_p1)
}
 0x10a   : > { %s765_s19 = scalar_lea.hbm %s1169_s22, 256  ;;  %s769_s15 = scalar_lea.hbm %s1312_s13, 768 }
 0x10b   : > { %p766_p4 = scmp.ne.s32.totalorder %s1169_s22, %s765_s19  ;;  %p770_p12 = scmp.lt.u32.totalorder %s1169_s22, %s1312_s13 }
 0x10c   : > { %p771_p10 = scmp.lt.u32.totalorder %s769_s15, %s765_s19  ;;  %p773_p13 = scmp.lt.u32.totalorder %s765_s19, %s1169_s22 }
 0x10d   : > { %p767_p6 = pnand %p766_p4, %p1313_p8 }
 0x10e   : > { %p772_p11 = por %p771_p10, %p770_p12 }
 0x10f   : > { %p768_p5 = pneg %p767_p6 }
 0x110   : > { %p774_p0 = por %p773_p13, %p772_p11 }
 0x112   : > { %p775_p2 = pnand %p774_p0, %p768_p5 }
 0x114   : > { %778 = shalt.err (!%p775_p2)
}
 0x115   : > { %496 = dma.vmem_to_hbm [thread:$0]  (%p1313_p8), %s270_s6, 256, %s1169_s22, %s246_s10, %s867_s5, %s867_s5, %s868_s9  }
 0x116   : > { %s779_s12 = scalar_lea.vmem %s302_s23, 256  ;;  %p786_p1 = scmp.lt.s32.totalorder %s302_s23, %s1045_s24 }
 0x117   : > { %p780_p7 = scmp.ne.s32.totalorder %s302_s23, %s779_s12  ;;  %p787_p4 = scmp.lt.s32.totalorder %s1048_s27, %s779_s12 }
 0x119   : > { %p781_p9 = pnand %p780_p7, %p1313_p8  ;;  %p788_p6 = por %p787_p4, %p786_p1 }
 0x11b   : > { %p782_p3 = pneg %p781_p9 }
 0x11d   : > { %p789_p5 = pnand %p788_p6, %p782_p3 }
 0x11f   : > { %792 = shalt.err (!%p789_p5)
}
 0x120   : > { %s793_s25 = scalar_lea.hbm %s1205_s16, 256  ;;  %s797_s6 = scalar_lea.hbm %s1317_s26, 768 }
 0x121   : > { %p794_p12 = scmp.ne.s32.totalorder %s1205_s16, %s793_s25  ;;  %p798_p13 = scmp.lt.u32.totalorder %s1205_s16, %s1317_s26 }
 0x122   : > { %p799_p0 = scmp.lt.u32.totalorder %s797_s6, %s793_s25  ;;  %p801_p7 = scmp.lt.u32.totalorder %s793_s25, %s1205_s16 }
 0x123   : > { %p795_p10 = pnand %p794_p12, %p1313_p8 }
 0x124   : > { %p800_p2 = por %p799_p0, %p798_p13 }
 0x125   : > { %p796_p11 = pneg %p795_p10 }
 0x126   : > { %p802_p9 = por %p801_p7, %p800_p2 }
 0x128   : > { %p803_p3 = pnand %p802_p9, %p796_p11 }
 0x12a   : > { %806 = shalt.err (!%p803_p3)
}
 0x12b   : > { %498 = dma.vmem_to_hbm [thread:$0]  (%p1313_p8), %s302_s23, 256, %s1205_s16, %s1171_s21, %s867_s5, %s867_s5, %s868_s9  }
 0x12c PF: > { %s1319_s27 = sld [smem:[#allocation33_spill]]  ;;  %s1320_s20 = sld [smem:[#allocation38_spill]] }
 0x12d   : > { %p513_p1 = scmp.ge.s32.totalorder %s853_s30, 1 }
 0x132   : > { %s316_s28 = sand.u32 1, %s1319_s27   ;;  %p1321_p4 = scmp.ne.s32.totalorder %s1320_s20, 0 }
 0x133   : > { %s317_s29 = scalar_lea.sflag [#allocation6], %s316_s28 }
 0x134   : > { %p503_p6 = pnand %p513_p1, %p1321_p4 }
 0x136   : > { %836 = dma.done.wait (!%p503_p6), %s317_s29, 256  }
 0x137   : > { %838 = vsyncadd (!%p503_p6), %s317_s29, 4294967040  ;;  %s1322_s10 = sadd.s32 4294967295, %s853_s30  }
 0x138   : > { %s325_s3 = sand.u32 1, %s1322_s10  }
 0x139   : > { %s326_s7 = scalar_lea.sflag [#allocation8], %s325_s3 }
 0x13a   : > { %840 = dma.done.wait (!%p503_p6), %s326_s7, 512  }
 0x13b   : > { %842 = vsyncadd (!%p503_p6), %s326_s7, 4294966784  ;;  %s1323_s30 = sld [smem:[#allocation35_spill]]  ;;  %s1324_s28 = sld [smem:[#allocation34_spill]] }
 0x13c   : > { %s1325_s29 = sld [smem:[#allocation36_spill]] }
 0x141   : > { %p23_p8 = scmp.ge.s32.totalorder %s1323_s30, 4  }
 0x143   :  { %25 = sbr.rel (!%p23_p8) target bundleno = 18 (0x12), region = 160 }
 0x14a   :  { %340 = vsyncpa [#allocation6], 1 }
 0x14b   :  { %342 = vsyncpa [#allocation6 + $0x1], 1 }
 0x14c   :  { %343 = vsyncpa [#allocation8], 1 }
 0x14d   :  { %345 = vsyncpa [#allocation8 + $0x1], 1 }
 0x14e   :  { %346 = vsyncmov [#allocation2] }
 0x151   :  { %s347_s21 = vpop.sfrf %346 }
 0x152   :  { %p480_p5 = scmp.ne.s32.totalorder %s347_s21, 0 }
 0x154   :  { %351 = shalt.err (%p480_p5)  }
 0x155   :  { %353 = vsyncmov [#allocation2 + $0x1] }
 0x158   :  { %s354_s5 = vpop.sfrf %353 }
 0x159   :  { %p481_p12 = scmp.ne.s32.totalorder %s354_s5, 0 }
 0x15b   :  { %358 = shalt.err (%p481_p12)  }
 0x15c   :  { %360 = vsyncmov [#allocation2 + $0x2] }
 0x15f   :  { %s361_s9 = vpop.sfrf %360 }
 0x160   :  { %p482_p10 = scmp.ne.s32.totalorder %s361_s9, 0 }
 0x162   :  { %365 = shalt.err (%p482_p10)  }

</bundles_post_ra>
